<compile_context>
chip_gen: v7x
topology: tpu7x:2x2x1
jax: 0.10.0
libtpu: 0.0.40
codegen_flags: <defaults>
</compile_context>

<pallas_src>
import functools
import math

import numpy as np
import jax
import jax.numpy as jnp
from jax.experimental import pallas as pl
from jax.experimental.pallas import tpu as pltpu

EPS = 1e-5  # torch.nn.LayerNorm default eps


# ----------------------------------------------------------- tuning utils ----

def _vmem_limit_bytes():
    """Scoped-VMEM limit: ~75% of physical, capped at 96 MiB.
    (v5e/v6e have 128 MiB physical VMEM, v7x only 64 MiB.)"""
    cap = None
    try:
        info = pltpu.get_tpu_info()
        cap = getattr(info, "vmem_capacity_bytes", None)
    except Exception:
        cap = None
    if not cap:
        cap = 64 << 20  # conservative fallback (v7x physical size)
    return min(96 << 20, int(cap) * 3 // 4)


def _pick_row_tile(b, h2, w2, c2, in_itemsize, out_itemsize, w_itemsize,
                   vmem_limit):
    """Largest TH dividing H/2 such that the per-step VMEM footprint fits the
    budget, the grid keeps >= 8 steps when possible (megacore + pipelining),
    and the flat output block stays sublane-aligned ((TH*W2) % 8 == 0)."""
    c4 = 2 * c2
    # Resident / fixed cost: (possibly double-buffered) weights + bias + slack.
    fixed = 2 * (c4 * c2 * w_itemsize + c2 * 4) + (1 << 20)
    budget = max(0, int(vmem_limit * 0.7) - fixed)
    # Per merged-row cost: 2x-buffered input (both parities) + 2x-buffered
    # output + ~7 f32/bf16-sized temporaries of (row, 2C) inside the kernel.
    per_row = w2 * (2 * (2 * c2) * in_itemsize
                    + 2 * c2 * out_itemsize
                    + 7 * c2 * 4)
    max_th_mem = max(1, budget // max(1, per_row))

    divs = [d for d in range(1, h2 + 1) if h2 % d == 0]
    aligned = [d for d in divs if (d * w2) % 8 == 0 or d == h2]

    min_steps = min(8, b * h2)  # >=8 grid steps when the problem allows it
    for need in (min_steps, 2, 1):
        cands = [d for d in aligned
                 if d <= max_th_mem and b * (h2 // d) >= need]
        if cands:
            return max(cands)
    return min(aligned)


# ------------------------------------------------------------------ kernel ----

def _patch_merging_kernel(x_ref, w0_ref, w1_ref, b_ref, o_ref, *,
                          eps, matmul_dtype):
    # x_ref: (TH, 2, W2, 2C) -- both height parities of TH merged rows; the
    # last dim is (w-parity, C) flattened, matching the product([0,1],[0,1])
    # channel order of the reference module.
    th, _, w2, c2 = x_ref.shape
    rows = th * w2
    inv_c4 = 1.0 / float(2 * c2)

    xh = x_ref[...]
    x0 = xh[:, 0].reshape(rows, c2).astype(jnp.float32)   # channels [0 : 2C)
    x1 = xh[:, 1].reshape(rows, c2).astype(jnp.float32)   # channels [2C: 4C)

    # LayerNorm(4C) statistics as partial sums over the two halves
    # (no lane-axis concat, no (rows, 4C) temporary).
    mu = (jnp.sum(x0, -1, keepdims=True)
          + jnp.sum(x1, -1, keepdims=True)) * inv_c4
    xc0 = x0 - mu
    xc1 = x1 - mu
    var = (jnp.sum(xc0 * xc0, -1, keepdims=True)
           + jnp.sum(xc1 * xc1, -1, keepdims=True)) * inv_c4
    r = jax.lax.rsqrt(var + eps)                           # (rows, 1)

    if matmul_dtype is not None:
        xc0 = xc0.astype(matmul_dtype)
        xc1 = xc1.astype(matmul_dtype)

    # Linear(4C -> 2C) split over K (the two parity halves); the LN affine is
    # pre-folded into w0/w1/bias, and the per-row rsqrt scale commutes with
    # the contraction so it is applied on the (rows, 2C) result.
    acc = jnp.dot(xc0, w0_ref[...], preferred_element_type=jnp.float32)
    acc = acc + jnp.dot(xc1, w1_ref[...], preferred_element_type=jnp.float32)
    o_ref[...] = (acc * r + b_ref[...]).astype(o_ref.dtype)


# ----------------------------------------------------------------- wrapper ----

def patch_merging(x, gamma, beta, w, b, *, matmul_dtype=jnp.bfloat16):
    """x: (B, H, W, C) -> (B, H/2, W/2, 2C).  w: (4C, 2C), b: (2C,).

    matmul_dtype: dtype of the MXU operands (default bf16; accumulation is
    always f32).  Pass None for exact f32 matmul semantics.
    """
    B, H, W, C = x.shape
    assert H % 2 == 0 and W % 2 == 0, "either height or width not div by 2"
    h2, w2 = H // 2, W // 2
    c2, c4 = 2 * C, 4 * C
    assert gamma.shape == (c4,) and beta.shape == (c4,)
    assert w.shape == (c4, c2) and b.shape == (c2,)

    # One-time, host-side fold of the LayerNorm affine into the Linear:
    #   ((xc * rsqrt) * gamma + beta) @ w + b
    #     == rsqrt * (xc @ (gamma[:,None] * w)) + (beta @ w + b)
    wf = (gamma[:, None].astype(jnp.float32) * w.astype(jnp.float32))
    bias_f = (beta.astype(jnp.float32) @ w.astype(jnp.float32)
              + b.astype(jnp.float32))
    w_dtype = jnp.float32 if matmul_dtype is None else matmul_dtype
    w0 = wf[:c2].astype(w_dtype)      # K-rows for the h-parity-0 channels
    w1 = wf[c2:].astype(w_dtype)      # K-rows for the h-parity-1 channels
    bias2 = bias_f.reshape(1, c2)

    # Free (metadata-only) reshape: (B,H,W,C) -> (B, H/2, 2, W/2, 2C);
    # the last dim is (w-parity, C) flattened.
    x5 = x.reshape(B, h2, 2, w2, c2)

    vmem_limit = _vmem_limit_bytes()
    th = _pick_row_tile(B, h2, w2, c2,
                        in_itemsize=x.dtype.itemsize,
                        out_itemsize=x.dtype.itemsize,
                        w_itemsize=np.dtype(w_dtype).itemsize,
                        vmem_limit=vmem_limit)

    kernel = functools.partial(_patch_merging_kernel, eps=EPS,
                               matmul_dtype=matmul_dtype)

    out_flat = pl.pallas_call(
        kernel,
        out_shape=jax.ShapeDtypeStruct((B, h2 * w2, c2), x.dtype),
        grid=(B, h2 // th),
        in_specs=[
            # Both height parities of TH merged rows: one contiguous HBM block.
            pl.BlockSpec((None, th, 2, w2, c2),
                         lambda bi, it: (bi, it, 0, 0, 0)),
            pl.BlockSpec((c2, c2), lambda bi, it: (0, 0)),   # w' rows [0:2C)
            pl.BlockSpec((c2, c2), lambda bi, it: (0, 0)),   # w' rows [2C:4C)
            pl.BlockSpec((1, c2), lambda bi, it: (0, 0)),    # fused bias
        ],
        # Flat (rows, 2C) output block: no sublane-collapsing store reshape.
        out_specs=pl.BlockSpec((None, th * w2, c2),
                               lambda bi, it: (bi, it, 0)),
        compiler_params=pltpu.CompilerParams(
            dimension_semantics=("parallel", "parallel"),
            vmem_limit_bytes=vmem_limit),
    )(x5, w0, w1, bias2)

    return out_flat.reshape(B, h2, w2, c2)


# --------------------------------------------------------------- reference ----

def patch_merging_reference(x, gamma, beta, w, b):
    """Pure-JAX mirror of the PyTorch module (for validation)."""
    parts = [x[:, hs::2, ws::2, :] for hs in (0, 1) for ws in (0, 1)]
    m = jnp.concatenate(parts, axis=-1)
    mu = jnp.mean(m, axis=-1, keepdims=True)
    var = jnp.mean((m - mu) ** 2, axis=-1, keepdims=True)
    y = (m - mu) * jax.lax.rsqrt(var + EPS) * gamma + beta
    return y @ w + b


# -------------------------------------------------------------------- main ----

if __name__ == "__main__":
    def _run_case(key, B, H, W, C):
        kx, kg, kb, kw, kbias = jax.random.split(key, 5)
        x = jax.random.normal(kx, (B, H, W, C), jnp.float32)
        gamma = 1.0 + 0.1 * jax.random.normal(kg, (4 * C,), jnp.float32)
        beta = 0.1 * jax.random.normal(kb, (4 * C,), jnp.float32)
        bound = 1.0 / math.sqrt(4 * C)
        w = jax.random.uniform(kw, (4 * C, 2 * C), jnp.float32, -bound, bound)
        b = jax.random.uniform(kbias, (2 * C,), jnp.float32, -bound, bound)

        ref = patch_merging_reference(x, gamma, beta, w, b)

        # Exact-semantics path (f32 matmul) -> tight tolerance.
        out_f32 = jax.block_until_ready(
            patch_merging(x, gamma, beta, w, b, matmul_dtype=None))
        assert out_f32.shape == (B, H // 2, W // 2, 2 * C), out_f32.shape
        assert jnp.all(jnp.isfinite(out_f32))
        assert jnp.allclose(out_f32, ref, atol=1e-4, rtol=1e-4), \
            float(jnp.max(jnp.abs(out_f32 - ref)))

        # Default fast path (bf16 MXU operands, f32 accumulation) -> relaxed.
        out_bf = jax.block_until_ready(patch_merging(x, gamma, beta, w, b))
        assert out_bf.shape == (B, H // 2, W // 2, 2 * C), out_bf.shape
        assert jnp.all(jnp.isfinite(out_bf))
        assert jnp.allclose(out_bf, ref, atol=6e-2, rtol=6e-2), \
            float(jnp.max(jnp.abs(out_bf - ref)))

    key = jax.random.PRNGKey(0)
    k1, k2 = jax.random.split(key)
    _run_case(k1, B=2, H=16, W=16, C=16)   # in_dim = 16
    _run_case(k2, B=1, H=32, W=32, C=8)    # different tiling / grid split

    print("KERNEL_OK")
</pallas_src>

<mosaic_0001>
module attributes {stable_mosaic.version = 11 : i64} {
  func.func @_patch_merging_kernel(%arg0: i32, %arg1: i32, %arg2: memref<1x2x2x8x32xf32, #tpu.memory_space<vmem>>, %arg3: memref<32x32xf32, #tpu.memory_space<vmem>>, %arg4: memref<32x32xf32, #tpu.memory_space<vmem>>, %arg5: memref<1x32xf32, #tpu.memory_space<vmem>>, %arg6: memref<1x16x32xf32, #tpu.memory_space<vmem>>) attributes {dimension_semantics = [#tpu.dimension_semantics<parallel>, #tpu.dimension_semantics<parallel>], iteration_bounds = array<i64: 2, 4>, scalar_prefetch = 0 : i64, scratch_operands = 0 : i64, tpu.core_type = #tpu.core_type<tc>, window_params = [{transform_indices = @transform_0, window_bounds = array<i64: 1, 2, 2, 8, 32>}, {pipeline_mode = #tpu.pipeline_mode<synchronous>, transform_indices = @transform_1, window_bounds = array<i64: 32, 32>}, {pipeline_mode = #tpu.pipeline_mode<synchronous>, transform_indices = @transform_2, window_bounds = array<i64: 32, 32>}, {pipeline_mode = #tpu.pipeline_mode<synchronous>, transform_indices = @transform_3, window_bounds = array<i64: 1, 32>}, {transform_indices = @transform_4, window_bounds = array<i64: 1, 16, 32>}]} {
    %c0 = arith.constant 0 : index
    %c0_0 = arith.constant 0 : index
    %c0_1 = arith.constant 0 : index
    %c0_2 = arith.constant 0 : index
    %c0_3 = arith.constant 0 : index
    %0 = vector.load %arg2[%c0, %c0_0, %c0_1, %c0_2, %c0_3] : memref<1x2x2x8x32xf32, #tpu.memory_space<vmem>>, vector<1x2x2x8x32xf32>
    %1 = vector.shape_cast %0 : vector<1x2x2x8x32xf32> to vector<2x2x8x32xf32>
    %2 = vector.extract_strided_slice %1 {offsets = [0, 0, 0, 0], sizes = [2, 1, 8, 32], strides = [1, 1, 1, 1]} : vector<2x2x8x32xf32> to vector<2x1x8x32xf32>
    %3 = vector.shape_cast %2 : vector<2x1x8x32xf32> to vector<2x8x32xf32>
    %4 = vector.shape_cast %3 : vector<2x8x32xf32> to vector<16x32xf32>
    %5 = vector.extract_strided_slice %1 {offsets = [0, 1, 0, 0], sizes = [2, 1, 8, 32], strides = [1, 1, 1, 1]} : vector<2x2x8x32xf32> to vector<2x1x8x32xf32>
    %6 = vector.shape_cast %5 : vector<2x1x8x32xf32> to vector<2x8x32xf32>
    %7 = vector.shape_cast %6 : vector<2x8x32xf32> to vector<16x32xf32>
    %cst = arith.constant dense<0.000000e+00> : vector<16xf32>
    %8 = vector.multi_reduction <add>, %4, %cst [1] : vector<16x32xf32> to vector<16xf32>
    %9 = vector.shape_cast %8 : vector<16xf32> to vector<16x1xf32>
    %cst_4 = arith.constant dense<0.000000e+00> : vector<16xf32>
    %10 = vector.multi_reduction <add>, %7, %cst_4 [1] : vector<16x32xf32> to vector<16xf32>
    %11 = vector.shape_cast %10 : vector<16xf32> to vector<16x1xf32>
    %12 = arith.addf %9, %11 : vector<16x1xf32>
    %cst_5 = arith.constant 1.562500e-02 : f32
    %13 = vector.broadcast %cst_5 : f32 to vector<16x1xf32>
    %14 = arith.mulf %12, %13 : vector<16x1xf32>
    %15 = vector.broadcast %14 : vector<16x1xf32> to vector<16x32xf32>
    %16 = arith.subf %4, %15 : vector<16x32xf32>
    %17 = vector.broadcast %14 : vector<16x1xf32> to vector<16x32xf32>
    %18 = arith.subf %7, %17 : vector<16x32xf32>
    %19 = arith.mulf %16, %16 : vector<16x32xf32>
    %cst_6 = arith.constant dense<0.000000e+00> : vector<16xf32>
    %20 = vector.multi_reduction <add>, %19, %cst_6 [1] : vector<16x32xf32> to vector<16xf32>
    %21 = vector.shape_cast %20 : vector<16xf32> to vector<16x1xf32>
    %22 = arith.mulf %18, %18 : vector<16x32xf32>
    %cst_7 = arith.constant dense<0.000000e+00> : vector<16xf32>
    %23 = vector.multi_reduction <add>, %22, %cst_7 [1] : vector<16x32xf32> to vector<16xf32>
    %24 = vector.shape_cast %23 : vector<16xf32> to vector<16x1xf32>
    %25 = arith.addf %21, %24 : vector<16x1xf32>
    %cst_8 = arith.constant 1.562500e-02 : f32
    %26 = vector.broadcast %cst_8 : f32 to vector<16x1xf32>
    %27 = arith.mulf %25, %26 : vector<16x1xf32>
    %cst_9 = arith.constant 9.99999974E-6 : f32
    %28 = vector.broadcast %cst_9 : f32 to vector<16x1xf32>
    %29 = arith.addf %27, %28 : vector<16x1xf32>
    %30 = math.rsqrt %29 : vector<16x1xf32>
    %c0_10 = arith.constant 0 : index
    %c0_11 = arith.constant 0 : index
    %31 = vector.load %arg3[%c0_10, %c0_11] : memref<32x32xf32, #tpu.memory_space<vmem>>, vector<32x32xf32>
    %cst_12 = arith.constant dense<0.000000e+00> : vector<16x32xf32>
    %32 = tpu.matmul %16, %31, %cst_12 {dimension_numbers = #tpu.dot_dimension_numbers<[1], [0], [0], [1], [0, 0, 1, 1], [], []>} : vector<16x32xf32>, vector<32x32xf32>, vector<16x32xf32> -> vector<16x32xf32>
    %c0_13 = arith.constant 0 : index
    %c0_14 = arith.constant 0 : index
    %33 = vector.load %arg4[%c0_13, %c0_14] : memref<32x32xf32, #tpu.memory_space<vmem>>, vector<32x32xf32>
    %cst_15 = arith.constant dense<0.000000e+00> : vector<16x32xf32>
    %34 = tpu.matmul %18, %33, %cst_15 {dimension_numbers = #tpu.dot_dimension_numbers<[1], [0], [0], [1], [0, 0, 1, 1], [], []>} : vector<16x32xf32>, vector<32x32xf32>, vector<16x32xf32> -> vector<16x32xf32>
    %35 = arith.addf %32, %34 : vector<16x32xf32>
    %36 = vector.broadcast %30 : vector<16x1xf32> to vector<16x32xf32>
    %37 = arith.mulf %35, %36 : vector<16x32xf32>
    %c0_16 = arith.constant 0 : index
    %c0_17 = arith.constant 0 : index
    %38 = vector.load %arg5[%c0_16, %c0_17] : memref<1x32xf32, #tpu.memory_space<vmem>>, vector<1x32xf32>
    %39 = vector.broadcast %38 : vector<1x32xf32> to vector<16x32xf32>
    %40 = arith.addf %37, %39 : vector<16x32xf32>
    %c0_18 = arith.constant 0 : index
    %c0_19 = arith.constant 0 : index
    %c0_20 = arith.constant 0 : index
    %41 = vector.load %arg6[%c0_18, %c0_19, %c0_20] : memref<1x16x32xf32, #tpu.memory_space<vmem>>, vector<1x16x32xf32>
    %42 = vector.shape_cast %41 : vector<1x16x32xf32> to vector<16x32xf32>
    %43 = vector.shape_cast %40 : vector<16x32xf32> to vector<1x16x32xf32>
    tpu.vector_store %arg6[%c0_18, %c0_19, %c0_20], %43 {strides = array<i32>} : memref<1x16x32xf32, #tpu.memory_space<vmem>>, vector<1x16x32xf32>,
    return
  }
  func.func @transform_0(%arg0: i32, %arg1: i32) -> (i32, i32, i32, i32, i32) {
    %c0_i32 = arith.constant 0 : i32
    %c0_i32_0 = arith.constant 0 : i32
    %c0_i32_1 = arith.constant 0 : i32
    %c0_i32_2 = arith.constant 0 : i32
    return %arg0, %arg1, %c0_i32, %c0_i32_0, %c0_i32_1 : i32, i32, i32, i32, i32
  }
  func.func @transform_1(%arg0: i32, %arg1: i32) -> (i32, i32) {
    %c0_i32 = arith.constant 0 : i32
    %c0_i32_0 = arith.constant 0 : i32
    %c0_i32_1 = arith.constant 0 : i32
    return %c0_i32, %c0_i32_0 : i32, i32
  }
  func.func @transform_2(%arg0: i32, %arg1: i32) -> (i32, i32) {
    %c0_i32 = arith.constant 0 : i32
    %c0_i32_0 = arith.constant 0 : i32
    %c0_i32_1 = arith.constant 0 : i32
    return %c0_i32, %c0_i32_0 : i32, i32
  }
  func.func @transform_3(%arg0: i32, %arg1: i32) -> (i32, i32) {
    %c0_i32 = arith.constant 0 : i32
    %c0_i32_0 = arith.constant 0 : i32
    %c0_i32_1 = arith.constant 0 : i32
    return %c0_i32, %c0_i32_0 : i32, i32
  }
  func.func @transform_4(%arg0: i32, %arg1: i32) -> (i32, i32, i32) {
    %c0_i32 = arith.constant 0 : i32
    %c0_i32_0 = arith.constant 0 : i32
    return %arg0, %arg1, %c0_i32 : i32, i32, i32
  }
}

</mosaic_0001>

<bundles_post_ra>
// kernel: tpu_custom_call.1
= control target key start
LH: loop header
LB: loop body
LE: loop exit
PB: predicated region body
PF: predicated region fallthrough
CT: control target
= control target key end

     0   :  { %s1238_s0 = inlined_call_operand.hbm [shape: f32[2,8,2,8,32], index: 0, kind: input, shape index: {}]   ;;  %s1239_s1 = inlined_call_operand.hbm [shape: f32[32,32], index: 1, kind: input, shape index: {}]   ;;  %s1240_s2 = inlined_call_operand.hbm [shape: f32[32,32], index: 2, kind: input, shape index: {}]   ;;  %s1241_s3 = inlined_call_operand.vmem [shape: f32[1,32], index: 3, kind: input, shape index: {}]   ;;  %s1242_s4 = inlined_call_operand.vmem [shape: f32[2,64,32], index: 4, kind: output, shape index: {}]  }
   0x1   :  { %1250 = sst [smem:[#allocation10_spill]] %s1239_s1 }
   0x2   :  { %1251 = sst [smem:[#allocation11_spill]] %s1240_s2 }
   0x3   :  { %9 = vsyncpa [#allocation3], 0 }
   0x4   :  { %11 = vsyncpa [#allocation3 + $0x1], 0 }
   0x5   :  { %12 = vsyncpa [#allocation5], 0  ;;  %s989_s15 = smov 0   ;;  %s991_s16 = smov 0  }
   0x6   :  { %s993_s17 = smov 0   ;;  %s995_s18 = smov 0  }
   0x7   :  { %s997_s19 = smov 0   ;;  %s999_s20 = smov 0  }
   0x8   :  { %s1001_s21 = smov 0   ;;  %s1003_s22 = smov 0  }
   0x9 LB: > { %s625_s23 = sadd.s32 4294967295, %s957_s22   ;;  %p52_p0 = scmp.ne.s32.totalorder %s933_s16, %s929_s15  ;;  %s957_s22 = sphi %s1003_s22, %s18_s22   ;;  %s953_s21 = sphi %s1001_s21, %s1274_s21   ;;  %s949_s20 = sphi %s999_s20, %s1273_s20   ;;  %s945_s19 = sphi %s997_s19, %s1272_s19   ;;  %s941_s18 = sphi %s995_s18, %s1271_s18   ;;  %s937_s17 = sphi %s993_s17, %s1270_s17   ;;  %s933_s16 = sphi %s991_s16, %s1269_s16   ;;  %s929_s15 = sphi %s989_s15, %s1268_s15  }
   0xa   : > { %p1029_p1 = scmp.eq.s32.totalorder %s625_s23, 0  ;;  %p627_p2 = scmp.ge.s32.totalorder %s957_s22, 1 }
   0xb   : > { %p154_p3 = scmp.lt.s32.totalorder %s957_s22, 9  ;;  %s959_s27 = smov [#allocation4]  }
   0xc   : > { %s1252_s24 = scalar_select %p1029_p1, 1, 0 }
   0xd   : > { %p1037_p4 = por %p1029_p1, %p52_p0  ;;  %p1041_p5 = pnand %p627_p2, %p154_p3 }
   0xe   : > { %s166_s28 = sshll.u32 %s959_s27, 4  ;;  %s960_s30 = smov [#allocation6]   ;;  %s167_s28 = int_to_ptr.vmem [resolvable:$true] %s166_s28 }
   0xf   : > { %s1253_s25 = scalar_select %p1037_p4, 1, 0 }
  0x10   : > { %s1254_s26 = scalar_select %p1041_p5, 1, 0 }
  0x11   : > { %p713_p6 = pneg %p1041_p5  ;;  %s179_s5 = sshll.u32 %s960_s30, 4  ;;  %s1053_s5 = int_to_ptr.vmem [resolvable:$true] %s179_s5 }
  0x12   : > { %s1256_s1 = sld [smem:[#allocation10_spill]] }
  0x13   : > { %p1049_p7 = pnand %p713_p6, %p1029_p1 }
  0x15   : > { %p803_p9 = pneg %p1049_p7 }
  0x18   : > { %s801_s8 = scalar_lea.hbm %s1256_s1, 512 }
  0x19   : > { %p802_p8 = scmp.ne.s32.totalorder %s1256_s1, %s801_s8  ;;  %p808_p12 = scmp.lt.u32.totalorder %s801_s8, %s1256_s1 }
  0x1b   : > { %p804_p10 = pnand %p803_p9, %p802_p8 }
  0x1d   : > { %p805_p11 = pneg %p804_p10 }
  0x1f   : > { %p810_p13 = pnand %p808_p12, %p805_p11 }
  0x21   : > { %813 = shalt.err (!%p810_p13)
}
  0x22   : > { %s814_s13 = scalar_lea.vmem %s167_s28, 512  ;;  %p822_p6 = scmp.lt.s32.totalorder %s167_s28, %s167_s28 }
  0x23   : > { %p815_p0 = scmp.ne.s32.totalorder %s167_s28, %s814_s13  ;;  %p823_p1 = scmp.lt.s32.totalorder %s814_s13, %s814_s13 }
  0x25   : > { %p817_p2 = pnand %p815_p0, %p803_p9  ;;  %p824_p4 = por %p823_p1, %p822_p6 }
  0x27   : > { %p818_p3 = pneg %p817_p2 }
  0x29   : > { %p825_p5 = pnand %p824_p4, %p818_p3 }
  0x2b   : > { %828 = shalt.err (!%p825_p5)
}
  0x2c   : > { %s1247_s14 = smov 128   ;;  %s1248_s15 = smov 8  }
  0x2d   : > { %716 = dma.hbm_to_vmem [thread:$0]  (!%p1049_p7), %s1256_s1, 512, %s167_s28, [#allocation5], %s1247_s14, %s1247_s14, %s1248_s15  }
  0x2e   : > { %s1257_s2 = sld [smem:[#allocation11_spill]] }
  0x34   : > { %s829_s7 = scalar_lea.hbm %s1257_s2, 512 }
  0x35   : > { %p830_p1 = scmp.ne.s32.totalorder %s1257_s2, %s829_s7  ;;  %p836_p8 = scmp.lt.u32.totalorder %s829_s7, %s1257_s2 }
  0x37   : > { %p832_p4 = pnand %p830_p1, %p803_p9 }
  0x39   : > { %p833_p5 = pneg %p832_p4 }
  0x3b   : > { %p838_p10 = pnand %p836_p8, %p833_p5 }
  0x3d   : > { %841 = shalt.err (!%p838_p10)
}
  0x3e   : > { %s842_s28 = scalar_lea.vmem %s1053_s5, 512  ;;  %p850_p0 = scmp.lt.s32.totalorder %s1053_s5, %s1053_s5 }
  0x3f   : > { %p843_p11 = scmp.ne.s32.totalorder %s1053_s5, %s842_s28  ;;  %p851_p2 = scmp.lt.s32.totalorder %s842_s28, %s842_s28 }
  0x41   : > { %p845_p12 = pnand %p843_p11, %p803_p9  ;;  %p852_p3 = por %p851_p2, %p850_p0 }
  0x43   : > { %p846_p13 = pneg %p845_p12 }
  0x45   : > { %p853_p6 = pnand %p852_p3, %p846_p13 }
  0x47   : > { %856 = shalt.err (!%p853_p6)
}
  0x48   : > { %719 = dma.hbm_to_vmem [thread:$0]  (!%p1049_p7), %s1257_s2, 512, %s1053_s5, [#allocation5], %s1247_s14, %s1247_s14, %s1248_s15  }
  0x49   : > { %s27_s29 = sadd.s32 1, %s949_s20  ;;  %s30_s23 = sadd.s32 1, %s953_s21 }
  0x4a   : > { %p28_p9 = scmp.ge.s32.totalorder %s27_s29, 4  ;;  %p46_p1 = scmp.ne.s32.totalorder %s937_s17, %s933_s16 }
  0x4b   : > { %p47_p4 = scmp.eq.s32.totalorder %s957_s22, 0  ;;  %s39_s30 = sadd.s32 1, %s937_s17 }
  0x4c   : > { %s1276_s29 = smov (%p28_p9, %s27_s29), 0  ;;  %s1278_s23 = smov (!%p28_p9, %s30_s23), %s953_s21 }
  0x4d   : > { %1258 = sst [smem:[#allocation9_spill]] %s1276_s29  ;;  %s35_s27 = ssub.s32 %s949_s20, %s1276_s29 }
  0x4e   : > { %p32_p5 = scmp.ge.s32.totalorder %s1278_s23, 2  ;;  %p1119_p8 = por %p47_p4, %p46_p1 }
  0x4f   : > { %p726_p7 = scmp.lt.s32.totalorder %s957_s22, 8  ;;  %s196_s5 = sand.u32 1, %s937_s17  }
  0x50   : > { %s1280_s23 = smov (%p32_p5, %s1278_s23), 0  ;;  %s631_s7 = sshll.u32 %s196_s5, 5 }
  0x51   : > { %s650_s8 = sshll.u32 %s949_s20, 2  ;;  %s34_s9 = ssub.s32 %s953_s21, %s1280_s23 }
  0x52   : > { %s36_s10 = sor.u32 %s35_s27, %s34_s9  ;;  %s634_s11 = sshll.u32 %s953_s21, 4 }
  0x53   : > { %p37_p10 = scmp.eq.s32.totalorder %s36_s10, 0  ;;  %s207_s28 = sadd.s32 %s650_s8, %s634_s11 }
  0x54   : > { %s635_s12 = sshll.u32 %s207_s28, 7  ;;  %s200_s13 = scalar_lea.vmem [#allocation2], %s631_s7 }
  0x55   : > { %s210_s14 = sshll.u32 %s200_s13, 4  ;;  %s1137_s29 = scalar_lea.hbm %s1238_s0, %s635_s12  ;;  %s1139_s14 = int_to_ptr.vmem [resolvable:$true] %s210_s14 }
  0x56   : > { %s1132_s15 = scalar_select %p37_p10, %s937_s17, %s39_s30  }
  0x57   : > { %p1145_p11 = pnand %p726_p7, %p1119_p8  ;;  %s1149_s30 = scalar_lea.sflag [#allocation3], %s196_s5 }
  0x58   : > { %s857_s7 = scalar_lea.hbm %s1137_s29, 512  ;;  %s862_s6 = scalar_lea.hbm %s1238_s0, 4096 }
  0x59   : > { %p858_p12 = scmp.ne.s32.totalorder %s1137_s29, %s857_s7  ;;  %p859_p13 = pneg %p1145_p11 }
  0x5a   : > { %p863_p3 = scmp.lt.u32.totalorder %s1137_s29, %s1238_s0  ;;  %p864_p6 = scmp.lt.u32.totalorder %s862_s6, %s857_s7 }
  0x5b   : > { %p860_p0 = pnand %p859_p13, %p858_p12  ;;  %p866_p1 = scmp.lt.u32.totalorder %s857_s7, %s1137_s29 }
  0x5c   : > { %p865_p9 = por %p864_p6, %p863_p3 }
  0x5d   : > { %p861_p2 = pneg %p860_p0 }
  0x5e   : > { %p867_p4 = por %p866_p1, %p865_p9 }
  0x60   : > { %p868_p5 = pnand %p867_p4, %p861_p2 }
  0x62   : > { %871 = shalt.err (!%p868_p5)
}
  0x63   : > { %s872_s5 = scalar_lea.vmem %s1139_s14, 512  ;;  %s963_s10 = smov [#allocation2]  }
  0x64   : > { %p873_p8 = scmp.ne.s32.totalorder %s1139_s14, %s872_s5  ;;  %s877_s11 = sshll.u32 %s963_s10, 4  ;;  %s878_s11 = int_to_ptr.vmem [resolvable:$false] %s877_s11 }
  0x65   : > { %s879_s28 = scalar_lea.vmem %s878_s11, 1024  ;;  %p880_p12 = scmp.lt.s32.totalorder %s1139_s14, %s878_s11 }
  0x66   : > { %p875_p7 = pnand %p873_p8, %p859_p13  ;;  %p881_p0 = scmp.lt.s32.totalorder %s879_s28, %s872_s5 }
  0x68   : > { %p876_p10 = pneg %p875_p7  ;;  %p882_p3 = por %p881_p0, %p880_p12 }
  0x6a   : > { %p883_p6 = pnand %p882_p3, %p876_p10 }
  0x6c   : > { %886 = shalt.err (!%p883_p6)
}
  0x6d   : > { %s1261_s12 = smov 8   ;;  %s1262_s13 = smov 128  }
  0x6e   : > { %723 = dma.hbm_to_vmem [thread:$0]  (!%p1145_p11), %s1137_s29, 512, %s1139_s14, %s1149_s30, %s1262_s13, %s1262_s13, %s1261_s12  }
  0x6f   : > { %p1263_p13 = scmp.ne.s32.totalorder %s1254_s26, 0 }
  0x70   : > { %s224_s7 = sand.u32 (!%p1263_p13), 1, %s933_s16   ;;  %p1264_p2 = scmp.ne.s32.totalorder (!%p1263_p13), %s1253_s25, 0 }
  0x71   : > { %222 = sbr.rel (%p1263_p13) target bundleno = 499 (0x1f3), region = 36  ;;  %s637_s1 = sshll.u32 (!%p1263_p13), %s224_s7, 5 }
  0x72   : > { %s225_s2 = scalar_lea.sflag (!%p1263_p13), [#allocation3], %s224_s7  ;;  %s228_s6 = scalar_lea.vmem (!%p1263_p13), [#allocation2], %s637_s1 }
  0x78   : > { %920 = dma.done.wait (%p1264_p2), %s225_s2, 512  }
  0x79   : > { %922 = vsyncadd (%p1264_p2), %s225_s2, 4294966784  ;;  %p1265_p9 = scmp.ne.s32.totalorder %s1252_s24, 0 }
  0x7b   : > { %924 = dma.done.wait (%p1265_p9), [#allocation5], 1024  }
  0x7c   : > { %926 = vsyncadd (%p1265_p9), [#allocation5], 4294966272  ;;  %vm280_vm0 = vcmask 261120   ;;  %v278_v0 = vld [vmem:[%s228_s6 + $0x10] sm:$0xff]  ;;  %v276_v1 = vld [vmem:[%s228_s6] sm:$0xff]  ;;  %s640_s24 = sshll.u32 %s941_s18, 1 }
  0x7d   : > { %v279_v2 = vld [vmem:[%s228_s6 + $0x18] sm:$0xff]  ;;  %v284_v3 = vsel %vm280_vm0, %v278_v0, 0.0  ;;  %v281_v4 = vsel %vm280_vm0, %v276_v1, 0.0  ;;  %v277_v5 = vld [vmem:[%s228_s6 + $0x8] sm:$0xff]  ;;  %v329_v8 = vld [vmem:[#allocation6] sm:$0xff]  ;;  %p267_p11 = scmp.lt.s32.totalorder %s945_s19, 1 }
  0x7e   : > { %285 = vadd.xlane.f32.xlu1 %v284_v3  ;;  %282 = vadd.xlane.f32.xlu0 %v281_v4  ;;  %v290_v6 = vsel %vm280_vm0, %v279_v2, 0.0  ;;  %v287_v7 = vsel %vm280_vm0, %v277_v5, 0.0  ;;  %v330_v9 = vld [vmem:[#allocation6 + $0x8] sm:$0xff]  ;;  %v325_v10 = vld [vmem:[#allocation4] sm:$0xff]  ;;  %v331_v14 = vld [vmem:[#allocation6 + $0x10] sm:$0xff]  ;;  %p269_p1 = scmp.lt.s32.totalorder %s640_s24, 7 }
  0x7f   : > { %v685_v11 = vpack.c.bf16 %v330_v9, %v329_v8  ;;  %v326_v12 = vld [vmem:[#allocation4 + $0x8] sm:$0xff]  ;;  %v332_v15 = vld [vmem:[#allocation6 + $0x18] sm:$0xff]  ;;  %v327_v16 = vld [vmem:[#allocation4 + $0x10] sm:$0xff]  ;;  %s1282_s19 = smov (!%p267_p11, %s945_s19), 1 }
  0x80   : > { %v693_v13 = vpack.c.bf16 %v326_v12, %v325_v10  ;;  %v689_v17 = vpack.c.bf16 %v332_v15, %v331_v14  ;;  %v328_v18 = vld [vmem:[#allocation4 + $0x18] sm:$0xff]  ;;  %s1284_s24 = smov (!%p269_p1, %s640_s24), 7  ;;  %s641_s25 = sshll.u32 %s1282_s19, 3  ;;  %v647_v56 = vld [vmem:[%s1241_s3] ss:$0 sm:$0xff] }
  0x81   : > { %686 = vmatprep.subr.bf16.mxu1 %v685_v11  ;;  %v697_v19 = vpack.c.bf16 %v328_v18, %v327_v16  ;;  %s272_s26 = sadd.s32 %s641_s25, %s1284_s24 }
  0x82   : > { %291 = vadd.xlane.f32.xlu1 %v290_v6  ;;  %288 = vadd.xlane.f32.xlu0 %v287_v7  ;;  %s642_s14 = sshll.u32 %s272_s26, 3 }
  0x83   : > { %694 = vmatprep.subr.bf16.mxu0 %v693_v13  ;;  %688 = vmatpush3.bf16.msra.mxu1 %v685_v11  ;;  %s274_s8 = scalar_lea.vmem %s1242_s4, %s642_s14 }
  0x84   : > { %696 = vmatpush3.bf16.msra.mxu0 %v693_v13  ;;  %690 = vmatprep.subr.bf16.mxu1 %v689_v17 }
  0x85   : > { %698 = vmatprep.subr.bf16.mxu0 %v697_v19 }
  0x87   : > { %692 = vmatpush3.bf16.msra.mxu1 %v689_v17 }
  0x88   : > { %700 = vmatpush3.bf16.msra.mxu0 %v697_v19 }
 0x10b   : > { %v286_v20 = vpop.xlane.xlu1 %285  ;;  %v283_v21 = vpop.xlane.xlu0 %282 }
 0x10f   : > { %v292_v22 = vpop.xlane.xlu1 %291  ;;  %v289_v23 = vpop.xlane.xlu0 %288 }
 0x110   : > { %v294_v24 = vadd.f32 %v292_v22, %v286_v20  ;;  %v293_v25 = vadd.f32 %v289_v23, %v283_v21 }
 0x112   : > { %v296_v26 = vmul.f32 0.015625, %v294_v24  ;;  %v295_v27 = vmul.f32 0.015625, %v293_v25 }
 0x114   : > { %v298_v28 = vsub.f32 %v278_v0, %v296_v26  ;;  %v300_v29 = vsub.f32 %v279_v2, %v296_v26  ;;  %v299_v30 = vsub.f32 %v277_v5, %v295_v27  ;;  %v297_v31 = vsub.f32 %v276_v1, %v295_v27 }
 0x116   : > { %671 = vmatprep.mubr.msk.f32.mxu1 %vm280_vm0, %v299_v30  ;;  %682 = vmatprep.mubr.msk.f32.mxu0 %vm280_vm0, %v297_v31  ;;  %v302_v32 = vmul.f32 %v298_v28, %v298_v28  ;;  %v301_v33 = vmul.f32 %v297_v31, %v297_v31  ;;  %v310_v36 = vmul.f32 %v300_v29, %v300_v29 }
 0x117   : > { %672 = vmatmul.mubr.msk.f32.vlgmr.msra.gmra.mrb[0].mxu1 %vm280_vm0, %v300_v29  ;;  %683 = vmatmul.mubr.msk.f32.vlgmr.msra.gmra.mrb[0].mxu0 %vm280_vm0, %v298_v28  ;;  %v309_v37 = vmul.f32 %v299_v30, %v299_v30 }
 0x118   : > { %v306_v34 = vsel %vm280_vm0, %v302_v32, 0.0  ;;  %v303_v35 = vsel %vm280_vm0, %v301_v33, 0.0  ;;  %v314_v38 = vsel %vm280_vm0, %v310_v36, 0.0 }
 0x119   : > { %307 = vadd.xlane.f32.xlu1 %v306_v34  ;;  %304 = vadd.xlane.f32.xlu0 %v303_v35  ;;  %v311_v39 = vsel %vm280_vm0, %v309_v37, 0.0 }
 0x11d   : > { %315 = vadd.xlane.f32.xlu1 %v314_v38  ;;  %312 = vadd.xlane.f32.xlu0 %v311_v39 }
 0x1a6   : > { %v308_v40 = vpop.xlane.xlu1 %307  ;;  %v305_v41 = vpop.xlane.xlu0 %304 }
 0x1aa   : > { %v316_v42 = vpop.xlane.xlu1 %315  ;;  %v313_v43 = vpop.xlane.xlu0 %312 }
 0x1ab   : > { %v318_v44 = vadd.f32 %v316_v42, %v308_v40  ;;  %v317_v45 = vadd.f32 %v313_v43, %v305_v41 }
 0x1ad   : > { %v320_v46 = vmul.f32 0.015625, %v318_v44  ;;  %v319_v47 = vmul.f32 0.015625, %v317_v45 }
 0x1af   : > { %v322_v48 = vadd.f32 1e-05, %v320_v46  ;;  %v321_v49 = vadd.f32 1e-05, %v319_v47 }
 0x1b1   : > { %797 = vrsqrt.f32 %v322_v48 }
 0x1b2   : > { %799 = vrsqrt.f32 %v321_v49 }
 0x1bb   : > { %v798_v55 = vpop.eup %797 }
 0x1bc   : > { %v800_v58 = vpop.eup %799 }
 0x1ea   : > { %v673_v50 = vpop.f32.mrb[0].mxu1  ;;  %v684_v51 = vpop.f32.mrb[0].mxu0 }
 0x1eb   : > { %v492_v52 = vadd.f32 %v684_v51, %v673_v50  ;;  %v405_v53 = vpop.f32.mrb[1].mxu1  ;;  %v486_v54 = vpop.f32.mrb[1].mxu0 }
 0x1ec   : > { %v487_v57 = vadd.f32 %v486_v54, %v405_v53 }
 0x1ed   : > { %v496_v59 = vmul.f32 %v798_v55, %v492_v52 }
 0x1ee   : > { %v495_v60 = vmul.f32 %v800_v58, %v487_v57 }
 0x1ef   : > { %v505_v61 = vadd.f32 %v647_v56, %v496_v59 }
 0x1f0   : > { %v504_v62 = vadd.f32 %v647_v56, %v495_v60 }
 0x1f1   : > { %507 = vst.msk [vmem:[%s274_s8 + $0x8] sm:$0xff] %vm280_vm0, %v505_v61 }
 0x1f2   : > { %506 = vst.msk [vmem:[%s274_s8] sm:$0xff] %vm280_vm0, %v504_v62 }
 0x1f3 PF: > { %s18_s22 = sadd.s32 1, %s957_s22   ;;  %s1266_s19 = smov %s1132_s15 }
 0x1f4   : > { %p15_p4 = scmp.ge.s32.totalorder %s18_s22, 10   ;;  %s1267_s9 = sld [smem:[#allocation9_spill]] }
 0x1f5   : > { %s1268_s15 = smov %s933_s16  ;;  %s1269_s16 = smov %s937_s17 }
 0x1f6   : > { %s1270_s17 = smov %s1266_s19  ;;  %s1271_s18 = smov %s949_s20 }
 0x1f7   : > { %s1272_s19 = smov %s953_s21  ;;  %s1274_s21 = smov %s1280_s23 }
 0x1f8   :  { %17 = sbr.rel (!%p15_p4) target bundleno = 9 (0x9), region = 84 }
 0x1fa   : > { %s1273_s20 = smov %s1267_s9 }
 0x1ff   :  { %538 = vsyncpa [#allocation3], 1 }
 0x200   :  { %540 = vsyncpa [#allocation3 + $0x1], 1 }
 0x201   :  { %541 = vsyncpa [#allocation5], 1 }

</bundles_post_ra>
